<compile_context>
chip_gen: v5e
topology: v5e:2x2
jax: 0.10.0
libtpu: 0.0.40
codegen_flags: <defaults>
</compile_context>

<pallas_src>
import jax
import jax.numpy as jnp
from jax.experimental import pallas as pl
from jax.experimental.pallas import tpu as pltpu

SUB = 8
LANE = 128
MIN_TILE = SUB * LANE                 # 1024 elements, one (8,128) f32 vreg
MAX_TILE_ELEMS = 512 * 1024           # 2 MiB f32 per input block (v7x-safe)
EPS = 1e-8


def _sse_kernel(x_ref, t_ref, acc_ref):
    """One grid step: one (1, TILE_BLK, 128) chunk of one image.

    acc_ref is the (1, 8, 128) f32 output block for this image; it stays
    resident across the reduction (k) axis and accumulates squared error.
    """
    k = pl.program_id(1)

    @pl.when(k == 0)
    def _init():
        acc_ref[...] = jnp.zeros_like(acc_ref)

    d = x_ref[...].astype(jnp.float32) - t_ref[...].astype(jnp.float32)
    sq = d * d
    # (1, TILE_BLK, 128) -> (1, TILE_BLK//8, 8, 128): layout-free regrouping of
    # whole (8,128) vreg tiles; summing axis=1 is pure VPU vreg adds.
    acc_ref[...] += sq.reshape(1, -1, SUB, LANE).sum(axis=1)


def psnr_loss(pred, target, loss_weight=1.0, max_val=1.0):
    """Pallas implementation of PSNRLoss.forward (reduction='mean')."""
    assert pred.ndim == 4 and pred.shape == target.shape
    n_b, c, h, w = pred.shape
    f = c * h * w

    x = pred.reshape(n_b, f)
    t = target.reshape(n_b, f)

    # Lane-dense tiling of the flattened per-image feature axis.
    f_pad = pl.cdiv(f, MIN_TILE) * MIN_TILE
    tile_f = min(f_pad, MAX_TILE_ELEMS)           # multiple of 1024
    f_total = pl.cdiv(f_pad, tile_f) * tile_f
    if f_total != f:
        # zero-pad both arrays: (0 - 0)^2 contributes nothing to the SSE
        x = jnp.pad(x, ((0, 0), (0, f_total - f)))
        t = jnp.pad(t, ((0, 0), (0, f_total - f)))

    nblk = f_total // LANE
    tile_blk = tile_f // LANE
    k_steps = f_total // tile_f

    x3 = x.reshape(n_b, nblk, LANE)
    t3 = t.reshape(n_b, nblk, LANE)

    sse_planes = pl.pallas_call(
        _sse_kernel,
        out_shape=jax.ShapeDtypeStruct((n_b, SUB, LANE), jnp.float32),
        grid_spec=pltpu.PrefetchScalarGridSpec(
            num_scalar_prefetch=0,
            grid=(n_b, k_steps),
            in_specs=[
                pl.BlockSpec((1, tile_blk, LANE), lambda i, k: (i, k, 0)),
                pl.BlockSpec((1, tile_blk, LANE), lambda i, k: (i, k, 0)),
            ],
            out_specs=pl.BlockSpec((1, SUB, LANE), lambda i, k: (i, 0, 0)),
        ),
        compiler_params=pltpu.CompilerParams(
            dimension_semantics=("parallel", "arbitrary"),
            vmem_limit_bytes=32 * 1024 * 1024,
        ),
    )(x3, t3)

    # Tiny (N,)-sized epilogue in plain JAX.
    sse = jnp.sum(sse_planes, axis=(1, 2))                     # (N,)
    mse = sse / jnp.float32(f)                                 # true count
    psnr = 10.0 * jnp.log10((max_val * max_val) / (mse + EPS))
    return -loss_weight * jnp.mean(psnr)


def _reference(pred, target, loss_weight=1.0, max_val=1.0):
    pred = pred.astype(jnp.float32)
    target = target.astype(jnp.float32)
    mse = jnp.mean((pred - target) ** 2, axis=(1, 2, 3))
    psnr = 10.0 * jnp.log10((max_val * max_val) / (mse + EPS))
    return -loss_weight * jnp.mean(psnr)


if __name__ == "__main__":
    key = jax.random.PRNGKey(0)
    k1, k2 = jax.random.split(key)
    # 4-D image-like inputs in [0, 1), as PSNR expects
    pred = jax.random.uniform(k1, (2, 4, 16, 16), dtype=jnp.float32)
    target = jax.random.uniform(k2, (2, 4, 16, 16), dtype=jnp.float32)

    loss = jax.block_until_ready(psnr_loss(pred, target))
    ref = jax.block_until_ready(_reference(pred, target))
    assert jnp.allclose(loss, ref, rtol=1e-5, atol=1e-5), (loss, ref)
    print("KERNEL_OK")
</pallas_src>

<mosaic_0001>
module attributes {stable_mosaic.version = 11 : i64} {
  func.func @_sse_kernel(%arg0: i32, %arg1: i32, %arg2: memref<1x8x128xf32, #tpu.memory_space<vmem>>, %arg3: memref<1x8x128xf32, #tpu.memory_space<vmem>>, %arg4: memref<1x8x128xf32, #tpu.memory_space<vmem>>) attributes {dimension_semantics = [#tpu.dimension_semantics<parallel>, #tpu.dimension_semantics<arbitrary>], iteration_bounds = array<i64: 2, 1>, scalar_prefetch = 0 : i64, scratch_operands = 0 : i64, tpu.core_type = #tpu.core_type<tc>, window_params = [{transform_indices = @transform_0, window_bounds = array<i64: 1, 8, 128>}, {transform_indices = @transform_1, window_bounds = array<i64: 1, 8, 128>}, {transform_indices = @transform_2, window_bounds = array<i64: 1, 8, 128>}]} {
    %c0_i32 = arith.constant 0 : i32
    %0 = arith.cmpi eq, %arg1, %c0_i32 : i32
    %1 = arith.extui %0 : i1 to i32
    %c0_i32_0 = arith.constant 0 : i32
    %2 = arith.cmpi ne, %1, %c0_i32_0 : i32
    scf.if %2 {
      %cst_12 = arith.constant 0.000000e+00 : f32
      %12 = vector.broadcast %cst_12 : f32 to vector<1x8x128xf32>
      %c0_13 = arith.constant 0 : index
      %c0_14 = arith.constant 0 : index
      %c0_15 = arith.constant 0 : index
      %13 = vector.load %arg4[%c0_13, %c0_14, %c0_15] : memref<1x8x128xf32, #tpu.memory_space<vmem>>, vector<1x8x128xf32>
      tpu.vector_store %arg4[%c0_13, %c0_14, %c0_15], %12 {strides = array<i32>} : memref<1x8x128xf32, #tpu.memory_space<vmem>>, vector<1x8x128xf32>,
    } else {
    }
    %c0 = arith.constant 0 : index
    %c0_1 = arith.constant 0 : index
    %c0_2 = arith.constant 0 : index
    %3 = vector.load %arg2[%c0, %c0_1, %c0_2] : memref<1x8x128xf32, #tpu.memory_space<vmem>>, vector<1x8x128xf32>
    %c0_3 = arith.constant 0 : index
    %c0_4 = arith.constant 0 : index
    %c0_5 = arith.constant 0 : index
    %4 = vector.load %arg3[%c0_3, %c0_4, %c0_5] : memref<1x8x128xf32, #tpu.memory_space<vmem>>, vector<1x8x128xf32>
    %5 = arith.subf %3, %4 : vector<1x8x128xf32>
    %6 = arith.mulf %5, %5 : vector<1x8x128xf32>
    %c0_6 = arith.constant 0 : index
    %c0_7 = arith.constant 0 : index
    %c0_8 = arith.constant 0 : index
    %7 = vector.load %arg4[%c0_6, %c0_7, %c0_8] : memref<1x8x128xf32, #tpu.memory_space<vmem>>, vector<1x8x128xf32>
    %8 = vector.shape_cast %6 : vector<1x8x128xf32> to vector<1x1x8x128xf32>
    %cst = arith.constant dense<0.000000e+00> : vector<1x8x128xf32>
    %9 = vector.multi_reduction <add>, %8, %cst [1] : vector<1x1x8x128xf32> to vector<1x8x128xf32>
    %10 = arith.addf %7, %9 : vector<1x8x128xf32>
    %c0_9 = arith.constant 0 : index
    %c0_10 = arith.constant 0 : index
    %c0_11 = arith.constant 0 : index
    %11 = vector.load %arg4[%c0_9, %c0_10, %c0_11] : memref<1x8x128xf32, #tpu.memory_space<vmem>>, vector<1x8x128xf32>
    tpu.vector_store %arg4[%c0_9, %c0_10, %c0_11], %10 {strides = array<i32>} : memref<1x8x128xf32, #tpu.memory_space<vmem>>, vector<1x8x128xf32>,
    return
  }
  func.func @transform_0(%arg0: i32, %arg1: i32) -> (i32, i32, i32) {
    %c0_i32 = arith.constant 0 : i32
    %c0_i32_0 = arith.constant 0 : i32
    return %arg0, %arg1, %c0_i32 : i32, i32, i32
  }
  func.func @transform_1(%arg0: i32, %arg1: i32) -> (i32, i32, i32) {
    %c0_i32 = arith.constant 0 : i32
    %c0_i32_0 = arith.constant 0 : i32
    return %arg0, %arg1, %c0_i32 : i32, i32, i32
  }
  func.func @transform_2(%arg0: i32, %arg1: i32) -> (i32, i32, i32) {
    %c0_i32 = arith.constant 0 : i32
    %c0_i32_0 = arith.constant 0 : i32
    %c0_i32_1 = arith.constant 0 : i32
    return %arg0, %c0_i32, %c0_i32_0 : i32, i32, i32
  }
}

</mosaic_0001>

<bundles_post_ra>
// kernel: tpu_custom_call.1
= control target key start
LH: loop header
LB: loop body
LE: loop exit
PB: predicated region body
PF: predicated region fallthrough
CT: control target
= control target key end

     0   :  { %7 = vsyncpa [#allocation3], 0  ;;  %s725_s0 = inlined_call_operand.hbm [shape: f32[2,8,128], index: 0, kind: input, shape index: {}]   ;;  %s726_s1 = inlined_call_operand.hbm [shape: f32[2,8,128], index: 1, kind: input, shape index: {}]   ;;  %s727_s2 = inlined_call_operand.hbm [shape: f32[2,8,128], index: 2, kind: output, shape index: {}]  }
   0x1   :  { %9 = vsyncpa [#allocation3 + $0x1], 0 }
   0x2   :  { %10 = vsyncpa [#allocation6], 0 }
   0x3   :  { %12 = vsyncpa [#allocation6 + $0x1], 0 }
   0x4   :  { %13 = vsyncpa [#allocation4], 0 }
   0x5   :  { %15 = vsyncpa [#allocation4 + $0x1], 0  ;;  %s597_s9 = smov 0   ;;  %s599_s10 = smov 0  }
   0x6   :  { %s601_s11 = smov 0   ;;  %s603_s12 = smov 0  }
   0x7   :  { %s605_s13 = smov 0   ;;  %s607_s14 = smov 0  }
   0x8 LB: > { %s350_s15 = sadd.s32 4294967295, %s580_s14   ;;  %s351_s16 = sadd.s32 4294967294, %s580_s14   ;;  %s580_s14 = sphi %s607_s14, %s21_s14   ;;  %s576_s13 = sphi %s605_s13, %s736_s13   ;;  %s572_s12 = sphi %s603_s12, %s735_s12   ;;  %s568_s11 = sphi %s601_s11, %s734_s11   ;;  %s564_s10 = sphi %s599_s10, %s733_s10   ;;  %s560_s9 = sphi %s597_s9, %s732_s9  }
   0x9   : > { %s33_s17 = sadd.s32 1, %s576_s13  ;;  %s42_s18 = sadd.s32 1, %s568_s11 }
   0xa   : > { %p35_p0 = scmp.ge.s32.totalorder %s33_s17, 2  ;;  %p49_p1 = scmp.ne.s32.totalorder %s568_s11, %s564_s10 }
   0xb   : > { %p50_p2 = scmp.eq.s32.totalorder %s580_s14, 0  ;;  %p55_p3 = scmp.ne.s32.totalorder %s564_s10, %s560_s9 }
   0xc   : > { %s738_s17 = smov (%p35_p0, %s33_s17), 0  ;;  %p56_p5 = scmp.eq.s32.totalorder %s350_s15, 0 }
   0xd   : > { %p638_p4 = por %p50_p2, %p49_p1  ;;  %s37_s20 = ssub.s32 %s576_s13, %s738_s17 }
   0xe   : > { %p107_p6 = scmp.eq.s32.totalorder %s350_s15, 1  ;;  %p40_p7 = scmp.eq.s32.totalorder %s37_s20, 0 }
   0xf   : > { %p644_p8 = por %p56_p5, %p55_p3  ;;  %p113_p10 = scmp.eq.s32.totalorder %s351_s16, 1 }
  0x10   : > { %p648_p9 = por %p107_p6, %p49_p1  ;;  %p353_p12 = scmp.ge.s32.totalorder %s580_s14, 2 }
  0x11   : > { %s653_s23 = scalar_select %p40_p7, %s568_s11, %s42_s18  }
  0x12   : > { %p655_p11 = por %p113_p10, %p55_p3  ;;  %p383_p13 = scmp.lt.s32.totalorder %s580_s14, 2 }
  0x13   : > { %s133_s25 = sand.u32 1, %s568_s11   ;;  %s355_s27 = sshll.u32 %s576_s13, 3 }
  0x14   : > { %s354_s26 = sshll.u32 %s133_s25, 3  ;;  %s142_s30 = scalar_lea.hbm %s725_s0, %s355_s27 }
  0x15   : > { %s137_s3 = scalar_lea.vmem [#allocation2], %s354_s26  ;;  %s144_s5 = sshll.u32 %s142_s30, 4  ;;  %s145_s5 = int_to_ptr.hbm [resolvable:$true] %s144_s5 }
  0x16   : > { %s146_s4 = sshll.u32 %s137_s3, 4  ;;  %p373_p0 = pnand %p383_p13, %p638_p4  ;;  %s147_s4 = int_to_ptr.vmem [resolvable:$true] %s146_s4 }
  0x17   : > { %p358_p1 = scmp.ge.s32.totalorder %s580_s14, 1  ;;  %p171_p2 = scmp.lt.s32.totalorder %s580_s14, 3 }
  0x18   : > { %s134_s6 = scalar_lea.sflag [#allocation3], %s133_s25  ;;  %s162_s15 = scalar_lea.hbm %s726_s1, %s355_s27 }
  0x19   : > { %375 = dma.hbm_to_vmem [thread:$0]  (!%p373_p0), %s145_s5, 128, %s147_s4, %s134_s6  }
  0x1a   : > { %p172_p3 = pnand %p358_p1, %p171_p2  ;;  %s157_s16 = scalar_lea.vmem [#allocation5], %s354_s26 }
  0x1b   : > { %s166_s18 = sshll.u32 %s157_s16, 4  ;;  %s164_s20 = sshll.u32 %s162_s15, 4  ;;  %s167_s18 = int_to_ptr.vmem [resolvable:$true] %s166_s18  ;;  %s165_s20 = int_to_ptr.hbm [resolvable:$true] %s164_s20 }
  0x1c   : > { %s154_s28 = scalar_lea.sflag [#allocation6], %s133_s25  ;;  %175 = sbr.rel (%p172_p3) target bundleno = 51 (0x33), region = 28 }
  0x1d   : > { %378 = dma.hbm_to_vmem [thread:$0]  (!%p373_p0), %s165_s20, 128, %s167_s18, %s154_s28  }
  0x1e   : > { %s674_s19 = sand.u32 (!%p172_p3), 1, %s564_s10  }
  0x1f   : > { %s359_s29 = sshll.u32 (!%p172_p3), %s674_s19, 3  ;;  %s178_s30 = scalar_lea.sflag (!%p172_p3), [#allocation3], %s674_s19 }
  0x20   : > { %s181_s3 = scalar_lea.vmem (!%p172_p3), [#allocation2], %s359_s29 }
  0x21   : > { %547 = dma.done.wait (%p644_p8), %s178_s30, 128  }
  0x22   : > { %549 = vsyncadd (%p644_p8), %s178_s30, 4294967168  ;;  %s188_s26 = scalar_lea.sflag [#allocation6], %s674_s19  ;;  %s191_s25 = scalar_lea.vmem [#allocation5], %s359_s29 }
  0x23   : > { %551 = dma.done.wait (%p644_p8), %s188_s26, 128  }
  0x24   : > { %553 = vsyncadd (%p644_p8), %s188_s26, 4294967168  ;;  %s363_s27 = sshll.u32 %s572_s12, 3  ;;  %v223_v0 = vld [vmem:[%s181_s3] sm:$0xff]  ;;  %v224_v1 = vld [vmem:[%s191_s25] sm:$0xff]  ;;  %s217_s7 = scalar_lea.vmem [#allocation7], %s359_s29 }
  0x25   : > { %s242_s6 = scalar_lea.hbm %s727_s2, %s363_s27  ;;  %v225_v2 = vsub.f32 %v223_v0, %v224_v1  ;;  %s244_s8 = sshll.u32 %s217_s7, 4  ;;  %s245_s8 = int_to_ptr.vmem [resolvable:$true] %s244_s8 }
  0x26   : > { %s246_s15 = sshll.u32 %s242_s6, 4  ;;  %s232_s21 = scalar_lea.sflag [#allocation4], %s674_s19  ;;  %s247_s15 = int_to_ptr.hbm [resolvable:$true] %s246_s15 }
  0x27   : > { %v226_v3 = vmul.f32 %v225_v2, %v225_v2  ;;  %s508_s16 = sshra.s32 %s247_s15, 4  ;;  %s514_s28 = scalar_lea.hbm %s727_s2, 16  ;;  %s509_s16 = int_to_ptr.hbm [resolvable:$true] %s508_s16 }
  0x28   : > { %s510_s18 = scalar_lea.hbm %s509_s16, 8  ;;  %p515_p7 = scmp.lt.s32.totalorder %s509_s16, %s727_s2 }
  0x29   : > { %230 = vst [vmem:[%s217_s7] sm:$0xff] %v226_v3  ;;  %p511_p4 = scmp.ne.s32.totalorder %s509_s16, %s510_s18  ;;  %p516_p8 = scmp.lt.s32.totalorder %s514_s28, %s510_s18 }
  0x2b   : > { %p512_p5 = pnand %p511_p4, %p648_p9  ;;  %p517_p10 = por %p516_p8, %p515_p7 }
  0x2d   : > { %p513_p6 = pneg %p512_p5 }
  0x2f   : > { %p518_p13 = pnand %p517_p10, %p513_p6 }
  0x31   : > { %521 = shalt.err (!%p518_p13)
}
  0x32   : > { %370 = dma.vmem_to_hbm [thread:$0]  (%p648_p9), %s245_s8, 128, %s247_s15, %s232_s21  }
  0x33 PF: > { %s258_s19 = sand.u32 1, %s560_s9   ;;  %p380_p0 = pnand %p353_p12, %p655_p11 }
  0x34   : > { %s259_s3 = scalar_lea.sflag [#allocation4], %s258_s19 }
  0x35   : > { %p381_p1 = pneg %p380_p0 }
  0x37   : > { %555 = dma.done.wait (%p381_p1), %s259_s3, 128  }
  0x38   : > { %557 = vsyncadd (%p381_p1), %s259_s3, 4294967168  ;;  %s21_s14 = sadd.s32 1, %s580_s14   ;;  %s732_s9 = smov %s564_s10 }
  0x39   : > { %p18_p2 = scmp.ge.s32.totalorder %s21_s14, 4   ;;  %s733_s10 = smov %s568_s11 }
  0x3a   : > { %s734_s11 = smov %s653_s23  ;;  %s735_s12 = smov %s576_s13 }
  0x3b   : > { %s736_s13 = smov %s738_s17  ;;  %20 = sbr.rel (!%p18_p2) target bundleno = 8 (0x8), region = 90 }
  0x40   :  { %265 = vsyncpa [#allocation3], 1 }
  0x41   :  { %267 = vsyncpa [#allocation3 + $0x1], 1 }
  0x42   :  { %268 = vsyncpa [#allocation6], 1 }
  0x43   :  { %270 = vsyncpa [#allocation6 + $0x1], 1 }
  0x44   :  { %271 = vsyncpa [#allocation4], 1 }
  0x45   :  { %273 = vsyncpa [#allocation4 + $0x1], 1 }

</bundles_post_ra>
